<compile_context>
chip_gen: v7x
topology: tpu7x:2x2x1
jax: 0.10.0
libtpu: 0.0.40
codegen_flags: <defaults>
</compile_context>

<pallas_src>
import functools

import jax
import jax.numpy as jnp
from jax.experimental import pallas as pl
from jax.experimental.pallas import tpu as pltpu

_ACT_PAD = 8  # pad the action axis to one full 8-sublane tile


def policy_kernel(xT_ref, w1_ref, w2_ref, b2_ref, oT_ref):
    """One batch tile of softmax(relu(x @ w1 + b1) @ w2 + b2), transposed.

    xT_ref : (n_states+1, block_b) bf16  -- last row is all-ones (b1 folded in)
    w1_ref : (hidden, n_states+1)  bf16  -- [w1.T | b1]
    w2_ref : (act_pad, hidden)     bf16  -- w2.T padded with zero rows to 8
    b2_ref : (act_pad, 1)          f32   -- b2, pad rows = -1e9 (=> prob 0)
    oT_ref : (act_pad, block_b)    f32   -- softmax probabilities (transposed)
    """
    # Layer 1 (+b1 via the ones row of x), ReLU.  bf16 MXU, f32 accumulate.
    h = jnp.dot(w1_ref[...], xT_ref[...], preferred_element_type=jnp.float32)
    h = jnp.maximum(h, 0.0).astype(jnp.bfloat16)                 # (hidden, block_b)

    # Layer 2, then b2 as a cheap VPU broadcast-add (keeps K exactly 128).
    logits = jnp.dot(w2_ref[...], h, preferred_element_type=jnp.float32)
    logits = logits + b2_ref[...]                                # (act_pad, block_b)

    # Numerically stable softmax over the (padded) action axis.  Pad rows have
    # bias -1e9, so exp underflows to exactly 0 and they contribute nothing.
    m = jnp.max(logits, axis=0, keepdims=True)
    e = jnp.exp(logits - m)
    denom = jnp.sum(e, axis=0, keepdims=True)
    oT_ref[...] = (e / denom).astype(oT_ref.dtype)               # exact normalization


def prepare_params(w1, b1, w2, b2):
    """Once-per-parameter-update weight packing (hoisted out of the forward)."""
    n_states, hidden = w1.shape
    n_actions = w2.shape[1]
    # Layer 1: fold b1 into an extra input column (matching the ones row of x).
    w1_aug = jnp.concatenate([w1.T, b1[:, None]], axis=1).astype(jnp.bfloat16)
    # Layer 2: transpose + zero-pad the action rows to a full 8-sublane tile.
    w2_pad = (
        jnp.zeros((_ACT_PAD, hidden), jnp.float32).at[:n_actions].set(w2.T)
    ).astype(jnp.bfloat16)
    # Pad-row biases are -1e9 so their softmax probability is exactly 0.
    b2_pad = jnp.full((_ACT_PAD, 1), -1e9, jnp.float32).at[:n_actions, 0].set(b2)
    return w1_aug, w2_pad, b2_pad


@functools.partial(jax.jit, static_argnames=("n_actions", "block_b"))
def policy_network_forward(x, w1_aug, w2_pad, b2_pad, *, n_actions=4, block_b=1024):
    """softmax(relu(x @ w1 + b1) @ w2 + b2); x: (B, n_states) -> (B, n_actions)."""
    B, n_states = x.shape
    hidden = w1_aug.shape[0]

    # Tiling: keep the whole batch in one tile whenever it fits -- per-grid-step
    # overhead (~0.35 us) dominates this ~5 MFLOP problem.  Only go multi-tile
    # when B exceeds block_b.
    block_b = max(128, -(-block_b // 128) * 128)
    if B <= block_b:
        num_tiles = 1
        Bp = max(128, -(-B // 128) * 128)
        block_b = Bp
    else:
        num_tiles = pl.cdiv(B, block_b)
        Bp = num_tiles * block_b

    # Transposed, ones-augmented, batch-padded activations (batch -> lane axis).
    x_aug = jnp.concatenate([x, jnp.ones((B, 1), x.dtype)], axis=1)
    if Bp != B:
        x_aug = jnp.pad(x_aug, ((0, Bp - B), (0, 0)))
    xT = x_aug.T.astype(jnp.bfloat16)                            # (n_states+1, Bp)

    oT = pl.pallas_call(
        policy_kernel,
        out_shape=jax.ShapeDtypeStruct((_ACT_PAD, Bp), jnp.float32),
        grid=(num_tiles,),
        in_specs=[
            # Activations: pipelined along the batch (lane) axis.
            pl.BlockSpec((n_states + 1, block_b), lambda i: (0, i)),
            # Weights / bias: constant block index -> fetched once, VMEM-resident.
            pl.BlockSpec((hidden, n_states + 1), lambda i: (0, 0)),
            pl.BlockSpec((_ACT_PAD, hidden), lambda i: (0, 0)),
            pl.BlockSpec((_ACT_PAD, 1), lambda i: (0, 0)),
        ],
        out_specs=pl.BlockSpec((_ACT_PAD, block_b), lambda i: (0, i)),
        compiler_params=pltpu.CompilerParams(
            # Only matters when the grid has >= 2 tiles (v7x megacore); no-op
            # for the single-tile default and on v5e/v6e.
            dimension_semantics=("parallel",),
        ),
    )(xT, w1_aug, w2_pad, b2_pad)

    # Drop the action padding and any batch padding; back to PyTorch layout.
    return oT[:n_actions, :B].T


if __name__ == "__main__":
    # FrozenLake 4x4: n_states = 16 (one-hot observation), n_actions = 4.
    n_states, n_actions, hidden = 16, 4, 128
    batch = 1024  # batch many envs / timesteps per call so the kernel isn't overhead-bound

    key = jax.random.PRNGKey(0)
    k1, k2, k3, k4, kx, kx2 = jax.random.split(key, 6)
    bound1 = 1.0 / jnp.sqrt(jnp.float32(n_states))
    bound2 = 1.0 / jnp.sqrt(jnp.float32(hidden))
    w1 = jax.random.uniform(k1, (n_states, hidden), jnp.float32, -bound1, bound1)
    b1 = jax.random.uniform(k2, (hidden,), jnp.float32, -bound1, bound1)
    w2 = jax.random.uniform(k3, (hidden, n_actions), jnp.float32, -bound2, bound2)
    b2 = jax.random.uniform(k4, (n_actions,), jnp.float32, -bound2, bound2)

    # Hoisted weight packing: done once, NOT in the per-call path.
    w1_aug, w2_pad, b2_pad = prepare_params(w1, b1, w2, b2)

    def ref_fwd(xs):  # plain f32 JAX reference (same math as the PyTorch forward)
        return jax.nn.softmax(jnp.maximum(xs @ w1 + b1, 0.0) @ w2 + b2, axis=-1)

    # Large-batch path: single batch tile (grid=(1,)).
    x = jax.random.uniform(kx, (batch, n_states), jnp.float32)
    out = jax.block_until_ready(
        policy_network_forward(x, w1_aug, w2_pad, b2_pad, n_actions=n_actions)
    )
    assert out.shape == (batch, n_actions)
    # Exact normalization -> rows sum to 1 to f32 precision.
    assert jnp.allclose(jnp.sum(out, axis=-1), 1.0, atol=1e-3)
    # bf16 MXU operands -> relaxed (still tight) tolerance vs the f32 reference.
    assert jnp.allclose(out, ref_fwd(x), atol=2e-2, rtol=2e-2)

    # Small / ragged batch path (exercises the lane-padding branch).
    x_small = jax.random.uniform(kx2, (2, n_states), jnp.float32)
    out_small = jax.block_until_ready(
        policy_network_forward(x_small, w1_aug, w2_pad, b2_pad, n_actions=n_actions)
    )
    assert out_small.shape == (2, n_actions)
    assert jnp.allclose(out_small, ref_fwd(x_small), atol=2e-2, rtol=2e-2)

    print("KERNEL_OK")
</pallas_src>

<mosaic_0001>
module attributes {stable_mosaic.version = 11 : i64} {
  func.func @policy_kernel(%arg0: i32, %arg1: memref<17x1024xbf16, #tpu.memory_space<vmem>>, %arg2: memref<128x17xbf16, #tpu.memory_space<vmem>>, %arg3: memref<8x128xbf16, #tpu.memory_space<vmem>>, %arg4: memref<8x1xf32, #tpu.memory_space<vmem>>, %arg5: memref<8x1024xf32, #tpu.memory_space<vmem>>) attributes {dimension_semantics = [#tpu.dimension_semantics<parallel>], iteration_bounds = array<i64: 1>, scalar_prefetch = 0 : i64, scratch_operands = 0 : i64, tpu.core_type = #tpu.core_type<tc>, window_params = [{transform_indices = @transform_0, window_bounds = array<i64: 17, 1024>}, {pipeline_mode = #tpu.pipeline_mode<synchronous>, transform_indices = @transform_1, window_bounds = array<i64: 128, 17>}, {pipeline_mode = #tpu.pipeline_mode<synchronous>, transform_indices = @transform_2, window_bounds = array<i64: 8, 128>}, {pipeline_mode = #tpu.pipeline_mode<synchronous>, transform_indices = @transform_3, window_bounds = array<i64: 8, 1>}, {transform_indices = @transform_4, window_bounds = array<i64: 8, 1024>}]} {
    %c0 = arith.constant 0 : index
    %c0_0 = arith.constant 0 : index
    %0 = vector.load %arg2[%c0, %c0_0] : memref<128x17xbf16, #tpu.memory_space<vmem>>, vector<128x17xbf16>
    %c0_1 = arith.constant 0 : index
    %c0_2 = arith.constant 0 : index
    %1 = vector.load %arg1[%c0_1, %c0_2] : memref<17x1024xbf16, #tpu.memory_space<vmem>>, vector<17x1024xbf16>
    %cst = arith.constant dense<0.000000e+00> : vector<128x1024xf32>
    %2 = tpu.matmul %0, %1, %cst {dimension_numbers = #tpu.dot_dimension_numbers<[1], [0], [0], [1], [0, 0, 1, 1], [], []>} : vector<128x17xbf16>, vector<17x1024xbf16>, vector<128x1024xf32> -> vector<128x1024xf32>
    %cst_3 = arith.constant 0.000000e+00 : f32
    %3 = vector.broadcast %cst_3 : f32 to vector<128x1024xf32>
    %4 = arith.maximumf %2, %3 : vector<128x1024xf32>
    %5 = arith.truncf %4 : vector<128x1024xf32> to vector<128x1024xbf16>
    %c0_4 = arith.constant 0 : index
    %c0_5 = arith.constant 0 : index
    %6 = vector.load %arg3[%c0_4, %c0_5] : memref<8x128xbf16, #tpu.memory_space<vmem>>, vector<8x128xbf16>
    %cst_6 = arith.constant dense<0.000000e+00> : vector<8x1024xf32>
    %7 = tpu.matmul %6, %5, %cst_6 {dimension_numbers = #tpu.dot_dimension_numbers<[1], [0], [0], [1], [0, 0, 1, 1], [], []>} : vector<8x128xbf16>, vector<128x1024xbf16>, vector<8x1024xf32> -> vector<8x1024xf32>
    %c0_7 = arith.constant 0 : index
    %c0_8 = arith.constant 0 : index
    %8 = vector.load %arg4[%c0_7, %c0_8] : memref<8x1xf32, #tpu.memory_space<vmem>>, vector<8x1xf32>
    %9 = vector.broadcast %8 : vector<8x1xf32> to vector<8x1024xf32>
    %10 = arith.addf %7, %9 : vector<8x1024xf32>
    %cst_9 = arith.constant dense<0xFF800000> : vector<1024xf32>
    %11 = vector.multi_reduction <maximumf>, %10, %cst_9 [0] : vector<8x1024xf32> to vector<1024xf32>
    %12 = vector.shape_cast %11 : vector<1024xf32> to vector<1x1024xf32>
    %13 = vector.broadcast %12 : vector<1x1024xf32> to vector<8x1024xf32>
    %14 = arith.subf %10, %13 : vector<8x1024xf32>
    %15 = math.exp %14 : vector<8x1024xf32>
    %cst_10 = arith.constant dense<0.000000e+00> : vector<1024xf32>
    %16 = vector.multi_reduction <add>, %15, %cst_10 [0] : vector<8x1024xf32> to vector<1024xf32>
    %17 = vector.shape_cast %16 : vector<1024xf32> to vector<1x1024xf32>
    %18 = vector.broadcast %17 : vector<1x1024xf32> to vector<8x1024xf32>
    %19 = arith.divf %15, %18 : vector<8x1024xf32>
    %c0_11 = arith.constant 0 : index
    %c0_12 = arith.constant 0 : index
    %20 = vector.load %arg5[%c0_11, %c0_12] : memref<8x1024xf32, #tpu.memory_space<vmem>>, vector<8x1024xf32>
    tpu.vector_store %arg5[%c0_11, %c0_12], %19 {strides = array<i32>} : memref<8x1024xf32, #tpu.memory_space<vmem>>, vector<8x1024xf32>,
    return
  }
  func.func @transform_0(%arg0: i32) -> (i32, i32) {
    %c0_i32 = arith.constant 0 : i32
    %c0_i32_0 = arith.constant 0 : i32
    return %c0_i32, %arg0 : i32, i32
  }
  func.func @transform_1(%arg0: i32) -> (i32, i32) {
    %c0_i32 = arith.constant 0 : i32
    %c0_i32_0 = arith.constant 0 : i32
    %c0_i32_1 = arith.constant 0 : i32
    return %c0_i32, %c0_i32_0 : i32, i32
  }
  func.func @transform_2(%arg0: i32) -> (i32, i32) {
    %c0_i32 = arith.constant 0 : i32
    %c0_i32_0 = arith.constant 0 : i32
    %c0_i32_1 = arith.constant 0 : i32
    return %c0_i32, %c0_i32_0 : i32, i32
  }
  func.func @transform_3(%arg0: i32) -> (i32, i32) {
    %c0_i32 = arith.constant 0 : i32
    %c0_i32_0 = arith.constant 0 : i32
    %c0_i32_1 = arith.constant 0 : i32
    return %c0_i32, %c0_i32_0 : i32, i32
  }
  func.func @transform_4(%arg0: i32) -> (i32, i32) {
    %c0_i32 = arith.constant 0 : i32
    %c0_i32_0 = arith.constant 0 : i32
    return %c0_i32, %arg0 : i32, i32
  }
}

</mosaic_0001>

<bundles_post_ra>
// kernel: policy_network_forward.1
= control target key start
LH: loop header
LB: loop body
LE: loop exit
PB: predicated region body
PF: predicated region fallthrough
CT: control target
= control target key end

     0   :  { %vm171_vm0 = vcmask 1040384   ;;  %v1267_v3 = vmov 0   ;;  %vm146_vm1 = vcmask 138240   ;;  %s1475_s0 = inlined_call_operand.vmem [shape: bf16[17,1024], index: 0, kind: input, shape index: {}]   ;;  %s1476_s1 = inlined_call_operand.vmem [shape: bf16[128,17], index: 1, kind: input, shape index: {}]   ;;  %s1477_s3 = inlined_call_operand.vmem [shape: f32[8,1], index: 3, kind: input, shape index: {}]   ;;  %s1478_s2 = inlined_call_operand.vmem [shape: bf16[8,128], index: 2, kind: input, shape index: {}]   ;;  %s1479_s4 = inlined_call_operand.vmem [shape: f32[8,1024], index: 4, kind: output, shape index: {}]  }
   0x1   :  { %v34_v0 = vld [vmem:[%s1475_s0] sm:$0xff]  ;;  %v35_v2 = vld [vmem:[%s1475_s0 + $0x8] sm:$0xff]  ;;  %230 = vmatprep.mubr.bf16.mxu0 %v1267_v3  ;;  %343 = vmatprep.mubr.bf16.mxu1 %v1267_v3  ;;  %v173_v8 = vsel %vm171_vm0, 65535, %v1267_v3  ;;  %v36_v16 = vld [vmem:[%s1475_s0 + $0x10] sm:$0xff] }
   0x2   :  { %v38_v1 = vld [vmem:[%s1475_s0 + $0x20] sm:$0xff]  ;;  %v39_v5 = vld [vmem:[%s1475_s0 + $0x28] sm:$0xff]  ;;  %1218 = vset.pattern.permute.xlu0 %v1267_v3  ;;  %v40_v17 = vld [vmem:[%s1475_s0 + $0x30] sm:$0xff] }
   0x3   :  { %v1170_v4 = vcombine.high %v34_v0, %v38_v1  ;;  %v1169_v6 = vcombine.low %v34_v0, %v38_v1  ;;  %v42_v7 = vld [vmem:[%s1475_s0 + $0x40] sm:$0x11]  ;;  %v43_v9 = vld [vmem:[%s1475_s0 + $0x48] sm:$0x11]  ;;  %v1172_v10 = vcombine.high %v35_v2, %v39_v5  ;;  %v1171_v11 = vcombine.low %v35_v2, %v39_v5  ;;  %v37_v18 = vld [vmem:[%s1475_s0 + $0x18] sm:$0xff] }
   0x4   :  { %v1178_v12 = vcombine.high %v42_v7, %v42_v7  ;;  %v1180_v13 = vcombine.high %v43_v9, %v43_v9  ;;  %v1177_v14 = vcombine.low %v42_v7, %v42_v7  ;;  %v1179_v15 = vcombine.low %v43_v9, %v43_v9  ;;  %v41_v21 = vld [vmem:[%s1475_s0 + $0x38] sm:$0xff]  ;;  %v1330_v26 = vld [vmem:[%s1476_s1] sm:$0xff]   ;;  %v44_v29 = vld [vmem:[%s1475_s0 + $0x50] sm:$0x11] }
   0x5   :  { %198 = vmatprep.subr.bf16.mxu0 %v1170_v4  ;;  %311 = vmatprep.subr.bf16.mxu1 %v1172_v10  ;;  %v1174_v24 = vcombine.high %v36_v16, %v40_v17  ;;  %v1176_v25 = vcombine.high %v37_v18, %v41_v21  ;;  %v1173_v27 = vcombine.low %v36_v16, %v40_v17  ;;  %v45_v30 = vld [vmem:[%s1475_s0 + $0x58] sm:$0x11]  ;;  %v1224_v39 = vld [vmem:[%s1476_s1 + $0x8] sm:$0xff]   ;;  %v1225_v40 = vld [vmem:[%s1476_s1 + $0x10] sm:$0xff]  }
   0x6   :  { %199 = vmatpush1.bf16.msra.mxu0 %v1169_v6  ;;  %v178_v19 = vand.u32 %v1178_v12, %v173_v8  ;;  %v184_v20 = vand.u32 %v1180_v13, %v173_v8  ;;  %312 = vmatpush1.bf16.msra.mxu1 %v1171_v11  ;;  %v175_v22 = vand.u32 %v1177_v14, %v173_v8  ;;  %v1226_v41 = vld [vmem:[%s1476_s1 + $0x18] sm:$0xff]   ;;  %v1227_v42 = vld [vmem:[%s1476_s1 + $0x20] sm:$0xff]   ;;  %v1232_v43 = vld [vmem:[%s1476_s1 + $0x28] sm:$0xff]  }
   0x7   :  { %v181_v23 = vand.u32 %v1179_v15, %v173_v8  ;;  %v1175_v28 = vcombine.low %v37_v18, %v41_v21  ;;  %v1181_v31 = vcombine.low %v44_v29, %v44_v29  ;;  %v1182_v32 = vcombine.high %v44_v29, %v44_v29  ;;  %v1233_v44 = vld [vmem:[%s1476_s1 + $0x30] sm:$0xff]   ;;  %v1234_v45 = vld [vmem:[%s1476_s1 + $0x38] sm:$0xff]   ;;  %v843_v1 = vld [vmem:[%s1477_s3] sm:$0xff] }
   0x8   :  { %200 = vmatprep.subr.bf16.mxu0 %v178_v19  ;;  %313 = vmatprep.subr.bf16.mxu1 %v184_v20  ;;  %v1183_v33 = vcombine.low %v45_v30, %v45_v30  ;;  %v1184_v34 = vcombine.high %v45_v30, %v45_v30 }
   0x9   :  { %v190_v35 = vand.u32 %v1182_v32, %v173_v8  ;;  %v187_v37 = vand.u32 %v1181_v31, %v173_v8  ;;  %846 = vperm.xlu0 %1218, %v843_v1  }
   0xa   :  { %201 = vmatpush1.bf16.msra.mxu0 %v175_v22  ;;  %314 = vmatpush1.bf16.msra.mxu1 %v181_v23  ;;  %v196_v36 = vand.u32 %v1184_v34, %v173_v8  ;;  %v193_v38 = vand.u32 %v1183_v33, %v173_v8 }
   0xb   :  { %424 = vmatprep.subr.bf16.mxu0 %v1174_v24  ;;  %537 = vmatprep.subr.bf16.mxu1 %v1176_v25 }
   0xd   :  { %1185 = vmatmul.mubr.msk.bf16.vlgmr.msra.gmra.mrb[0].mxu0 %vm146_vm1, %v1330_v26  ;;  %1193 = vmatmul.mubr.msk.bf16.vlgmr.msra.gmra.mrb[0].mxu1 %vm146_vm1, %v1330_v26 }
   0xe   :  { %425 = vmatpush1.bf16.msra.mxu0 %v1173_v27  ;;  %538 = vmatpush1.bf16.msra.mxu1 %v1175_v28 }
   0xf   :  { %240 = vmatprep.mubr.bf16.mxu0 %v1267_v3  ;;  %353 = vmatprep.mubr.bf16.mxu1 %v1267_v3 }
  0x10   :  { %426 = vmatprep.subr.bf16.mxu0 %v190_v35  ;;  %539 = vmatprep.subr.bf16.mxu1 %v196_v36 }
  0x12   :  { %427 = vmatpush1.bf16.msra.mxu0 %v187_v37  ;;  %540 = vmatpush1.bf16.msra.mxu1 %v193_v38 }
  0x15   :  { %1186 = vmatmul.mubr.msk.bf16.gmra.mrb[4].mxu0 %vm146_vm1, %v1224_v39  ;;  %1194 = vmatmul.mubr.msk.bf16.gmra.mrb[4].mxu1 %vm146_vm1, %v1224_v39 }
  0x16   :  { %250 = vmatprep.mubr.bf16.mxu0 %v1267_v3  ;;  %363 = vmatprep.mubr.bf16.mxu1 %v1267_v3 }
  0x1d   :  { %1187 = vmatmul.mubr.msk.bf16.gmra.mrb[8].mxu0 %vm146_vm1, %v1225_v40  ;;  %1195 = vmatmul.mubr.msk.bf16.gmra.mrb[8].mxu1 %vm146_vm1, %v1225_v40 }
  0x1e   :  { %260 = vmatprep.mubr.bf16.mxu0 %v1267_v3  ;;  %373 = vmatprep.mubr.bf16.mxu1 %v1267_v3 }
  0x25   :  { %1188 = vmatmul.mubr.msk.bf16.gmra.mrb[12].mxu0 %vm146_vm1, %v1226_v41  ;;  %1196 = vmatmul.mubr.msk.bf16.gmra.mrb[12].mxu1 %vm146_vm1, %v1226_v41 }
  0x26   :  { %270 = vmatprep.mubr.bf16.mxu0 %v1267_v3  ;;  %383 = vmatprep.mubr.bf16.mxu1 %v1267_v3 }
  0x2d   :  { %1189 = vmatmul.mubr.msk.bf16.gmra.mrb[16].mxu0 %vm146_vm1, %v1227_v42  ;;  %1197 = vmatmul.mubr.msk.bf16.gmra.mrb[16].mxu1 %vm146_vm1, %v1227_v42 }
  0x2e   :  { %280 = vmatprep.mubr.bf16.mxu0 %v1267_v3  ;;  %393 = vmatprep.mubr.bf16.mxu1 %v1267_v3 }
  0x35   :  { %1190 = vmatmul.mubr.msk.bf16.gmra.mrb[20].mxu0 %vm146_vm1, %v1232_v43  ;;  %1198 = vmatmul.mubr.msk.bf16.gmra.mrb[20].mxu1 %vm146_vm1, %v1232_v43 }
  0x36   :  { %290 = vmatprep.mubr.bf16.mxu0 %v1267_v3  ;;  %403 = vmatprep.mubr.bf16.mxu1 %v1267_v3 }
  0x3d   :  { %1191 = vmatmul.mubr.msk.bf16.gmra.mrb[24].mxu0 %vm146_vm1, %v1233_v44  ;;  %1199 = vmatmul.mubr.msk.bf16.gmra.mrb[24].mxu1 %vm146_vm1, %v1233_v44 }
  0x3e   :  { %300 = vmatprep.mubr.bf16.mxu0 %v1267_v3  ;;  %413 = vmatprep.mubr.bf16.mxu1 %v1267_v3 }
  0x45   :  { %1192 = vmatmul.mubr.msk.bf16.gmra.mrb[28].mxu0 %vm146_vm1, %v1234_v45  ;;  %1200 = vmatmul.mubr.msk.bf16.gmra.mrb[28].mxu1 %vm146_vm1, %v1234_v45 }
  0x46   :  { %456 = vmatprep.mubr.bf16.mxu0 %v1267_v3  ;;  %569 = vmatprep.mubr.bf16.mxu1 %v1267_v3 }
  0x4d   :  { %1201 = vmatmul.mubr.msk.bf16.vlgmr.msra.gmra.mrb[32].mxu0 %vm146_vm1, %v1330_v26  ;;  %1209 = vmatmul.mubr.msk.bf16.vlgmr.msra.gmra.mrb[32].mxu1 %vm146_vm1, %v1330_v26 }
  0x4e   :  { %466 = vmatprep.mubr.bf16.mxu0 %v1267_v3  ;;  %579 = vmatprep.mubr.bf16.mxu1 %v1267_v3 }
  0x55   :  { %1202 = vmatmul.mubr.msk.bf16.gmra.mrb[36].mxu0 %vm146_vm1, %v1224_v39  ;;  %1210 = vmatmul.mubr.msk.bf16.gmra.mrb[36].mxu1 %vm146_vm1, %v1224_v39 }
  0x56   :  { %476 = vmatprep.mubr.bf16.mxu0 %v1267_v3  ;;  %589 = vmatprep.mubr.bf16.mxu1 %v1267_v3 }
  0x5d   :  { %1203 = vmatmul.mubr.msk.bf16.gmra.mrb[40].mxu0 %vm146_vm1, %v1225_v40  ;;  %1211 = vmatmul.mubr.msk.bf16.gmra.mrb[40].mxu1 %vm146_vm1, %v1225_v40 }
  0x5e   :  { %486 = vmatprep.mubr.bf16.mxu0 %v1267_v3  ;;  %599 = vmatprep.mubr.bf16.mxu1 %v1267_v3 }
  0x65   :  { %1204 = vmatmul.mubr.msk.bf16.gmra.mrb[44].mxu0 %vm146_vm1, %v1226_v41  ;;  %1212 = vmatmul.mubr.msk.bf16.gmra.mrb[44].mxu1 %vm146_vm1, %v1226_v41 }
  0x66   :  { %496 = vmatprep.mubr.bf16.mxu0 %v1267_v3  ;;  %609 = vmatprep.mubr.bf16.mxu1 %v1267_v3 }
  0x6d   :  { %1205 = vmatmul.mubr.msk.bf16.gmra.mrb[48].mxu0 %vm146_vm1, %v1227_v42  ;;  %1213 = vmatmul.mubr.msk.bf16.gmra.mrb[48].mxu1 %vm146_vm1, %v1227_v42 }
  0x6e   :  { %506 = vmatprep.mubr.bf16.mxu0 %v1267_v3  ;;  %619 = vmatprep.mubr.bf16.mxu1 %v1267_v3 }
  0x75   :  { %1206 = vmatmul.mubr.msk.bf16.gmra.mrb[52].mxu0 %vm146_vm1, %v1232_v43  ;;  %1214 = vmatmul.mubr.msk.bf16.gmra.mrb[52].mxu1 %vm146_vm1, %v1232_v43 }
  0x76   :  { %516 = vmatprep.mubr.bf16.mxu0 %v1267_v3  ;;  %629 = vmatprep.mubr.bf16.mxu1 %v1267_v3 }
  0x7d   :  { %1207 = vmatmul.mubr.msk.bf16.gmra.mrb[56].mxu0 %vm146_vm1, %v1233_v44  ;;  %1215 = vmatmul.mubr.msk.bf16.gmra.mrb[56].mxu1 %vm146_vm1, %v1233_v44 }
  0x7e   :  { %526 = vmatprep.mubr.bf16.mxu0 %v1267_v3  ;;  %639 = vmatprep.mubr.bf16.mxu1 %v1267_v3 }
  0x85   :  { %1208 = vmatmul.mubr.msk.bf16.gmra.mrb[60].mxu0 %vm146_vm1, %v1234_v45  ;;  %1216 = vmatmul.mubr.msk.bf16.gmra.mrb[60].mxu1 %vm146_vm1, %v1234_v45 }
  0x86   :  { %881 = vmatprep.mubr.bf16.mxu0 %v1267_v3  ;;  %922 = vmatprep.mubr.bf16.mxu1 %v1267_v3 }
  0xe0   :  { %v232_v46 = vpop.f32.mrb[0].mxu0  ;;  %v345_v47 = vpop.f32.mrb[0].mxu1 }
  0xe1   :  { %v234_v48 = vpop.f32.mrb[1].mxu0  ;;  %v347_v49 = vpop.f32.mrb[1].mxu1  ;;  %v650_v51 = vmax.f32 %v232_v46, 0.0  ;;  %v652_v55 = vmax.f32 %v345_v47, 0.0 }
  0xe2   :  { %v236_v50 = vpop.f32.mrb[2].mxu0  ;;  %v349_v53 = vpop.f32.mrb[2].mxu1  ;;  %v651_v56 = vmax.f32 %v234_v48, 0.0  ;;  %v653_v60 = vmax.f32 %v347_v49, 0.0 }
  0xe3   :  { %v658_v52 = vmax.f32 %v236_v50, 0.0  ;;  %v238_v54 = vpop.f32.mrb[3].mxu0  ;;  %v660_v57 = vmax.f32 %v349_v53, 0.0  ;;  %v351_v59 = vpop.f32.mrb[3].mxu1 }
  0xe4   :  { %v659_v58 = vmax.f32 %v238_v54, 0.0  ;;  %v661_v62 = vmax.f32 %v351_v59, 0.0 }
  0xe5   :  { %v778_v61 = vpack.c.bf16 %v658_v52, %v650_v51  ;;  %v780_v63 = vpack.c.bf16 %v660_v57, %v652_v55 }
  0xe6   :  { %v779_v0 = vpack.c.bf16 %v659_v58, %v651_v56  ;;  %v781_v2 = vpack.c.bf16 %v661_v62, %v653_v60 }
  0xe8   :  { %v242_v4 = vpop.f32.mrb[4].mxu0  ;;  %849 = vmatprep.subr.bf16.mxu0 %v779_v0  ;;  %v355_v5 = vpop.f32.mrb[4].mxu1  ;;  %890 = vmatprep.subr.bf16.mxu1 %v781_v2 }
  0xe9   :  { %v244_v6 = vpop.f32.mrb[5].mxu0  ;;  %850 = vmatpush1.bf16.msra.mxu0 %v778_v61  ;;  %v357_v7 = vpop.f32.mrb[5].mxu1  ;;  %891 = vmatpush1.bf16.msra.mxu1 %v780_v63  ;;  %v666_v9 = vmax.f32 %v242_v4, 0.0  ;;  %v668_v13 = vmax.f32 %v355_v5, 0.0 }
  0xea   :  { %v246_v8 = vpop.f32.mrb[6].mxu0  ;;  %v359_v11 = vpop.f32.mrb[6].mxu1  ;;  %v667_v14 = vmax.f32 %v244_v6, 0.0  ;;  %v669_v18 = vmax.f32 %v357_v7, 0.0 }
  0xeb   :  { %v674_v10 = vmax.f32 %v246_v8, 0.0  ;;  %v248_v12 = vpop.f32.mrb[7].mxu0  ;;  %v676_v15 = vmax.f32 %v359_v11, 0.0  ;;  %v361_v17 = vpop.f32.mrb[7].mxu1 }
  0xec   :  { %v675_v16 = vmax.f32 %v248_v12, 0.0  ;;  %v677_v20 = vmax.f32 %v361_v17, 0.0 }
  0xed   :  { %v786_v19 = vpack.c.bf16 %v674_v10, %v666_v9  ;;  %v788_v21 = vpack.c.bf16 %v676_v15, %v668_v13 }
  0xee   :  { %v787_v22 = vpack.c.bf16 %v675_v16, %v667_v14  ;;  %v789_v23 = vpack.c.bf16 %v677_v20, %v669_v18 }
  0xf0   :  { %v252_v24 = vpop.f32.mrb[8].mxu0  ;;  %851 = vmatprep.subr.bf16.mxu0 %v787_v22  ;;  %v365_v25 = vpop.f32.mrb[8].mxu1  ;;  %892 = vmatprep.subr.bf16.mxu1 %v789_v23 }
  0xf1   :  { %v254_v26 = vpop.f32.mrb[9].mxu0  ;;  %852 = vmatpush1.bf16.msra.mxu0 %v786_v19  ;;  %v367_v27 = vpop.f32.mrb[9].mxu1  ;;  %893 = vmatpush1.bf16.msra.mxu1 %v788_v21  ;;  %v682_v29 = vmax.f32 %v252_v24, 0.0  ;;  %v684_v33 = vmax.f32 %v365_v25, 0.0 }
  0xf2   :  { %v256_v28 = vpop.f32.mrb[10].mxu0  ;;  %v369_v31 = vpop.f32.mrb[10].mxu1  ;;  %v683_v34 = vmax.f32 %v254_v26, 0.0  ;;  %v685_v38 = vmax.f32 %v367_v27, 0.0 }
  0xf3   :  { %v690_v30 = vmax.f32 %v256_v28, 0.0  ;;  %v258_v32 = vpop.f32.mrb[11].mxu0  ;;  %v692_v35 = vmax.f32 %v369_v31, 0.0  ;;  %v371_v37 = vpop.f32.mrb[11].mxu1 }
  0xf4   :  { %v691_v36 = vmax.f32 %v258_v32, 0.0  ;;  %v693_v40 = vmax.f32 %v371_v37, 0.0 }
  0xf5   :  { %v794_v39 = vpack.c.bf16 %v690_v30, %v682_v29  ;;  %v796_v41 = vpack.c.bf16 %v692_v35, %v684_v33 }
  0xf6   :  { %v795_v42 = vpack.c.bf16 %v691_v36, %v683_v34  ;;  %v797_v43 = vpack.c.bf16 %v693_v40, %v685_v38 }
  0xf8   :  { %v262_v44 = vpop.f32.mrb[12].mxu0  ;;  %853 = vmatprep.subr.bf16.mxu0 %v795_v42  ;;  %v375_v45 = vpop.f32.mrb[12].mxu1  ;;  %894 = vmatprep.subr.bf16.mxu1 %v797_v43 }
  0xf9   :  { %v264_v46 = vpop.f32.mrb[13].mxu0  ;;  %854 = vmatpush1.bf16.msra.mxu0 %v794_v39  ;;  %v377_v47 = vpop.f32.mrb[13].mxu1  ;;  %895 = vmatpush1.bf16.msra.mxu1 %v796_v41  ;;  %v698_v49 = vmax.f32 %v262_v44, 0.0  ;;  %v700_v53 = vmax.f32 %v375_v45, 0.0 }
  0xfa   :  { %v266_v48 = vpop.f32.mrb[14].mxu0  ;;  %v379_v51 = vpop.f32.mrb[14].mxu1  ;;  %v699_v54 = vmax.f32 %v264_v46, 0.0  ;;  %v701_v58 = vmax.f32 %v377_v47, 0.0 }
  0xfb   :  { %v706_v50 = vmax.f32 %v266_v48, 0.0  ;;  %v268_v52 = vpop.f32.mrb[15].mxu0  ;;  %v708_v55 = vmax.f32 %v379_v51, 0.0  ;;  %v381_v57 = vpop.f32.mrb[15].mxu1 }
  0xfc   :  { %v707_v56 = vmax.f32 %v268_v52, 0.0  ;;  %v709_v60 = vmax.f32 %v381_v57, 0.0 }
  0xfd   :  { %v802_v59 = vpack.c.bf16 %v706_v50, %v698_v49  ;;  %v804_v61 = vpack.c.bf16 %v708_v55, %v700_v53 }
  0xfe   :  { %v803_v62 = vpack.c.bf16 %v707_v56, %v699_v54  ;;  %v805_v63 = vpack.c.bf16 %v709_v60, %v701_v58 }
 0x100   :  { %v272_v0 = vpop.f32.mrb[16].mxu0  ;;  %855 = vmatprep.subr.bf16.mxu0 %v803_v62  ;;  %v385_v1 = vpop.f32.mrb[16].mxu1  ;;  %896 = vmatprep.subr.bf16.mxu1 %v805_v63 }
 0x101   :  { %v274_v2 = vpop.f32.mrb[17].mxu0  ;;  %856 = vmatpush1.bf16.msra.mxu0 %v802_v59  ;;  %v387_v4 = vpop.f32.mrb[17].mxu1  ;;  %897 = vmatpush1.bf16.msra.mxu1 %v804_v61  ;;  %v714_v6 = vmax.f32 %v272_v0, 0.0  ;;  %v716_v10 = vmax.f32 %v385_v1, 0.0 }
 0x102   :  { %v276_v5 = vpop.f32.mrb[18].mxu0  ;;  %v389_v8 = vpop.f32.mrb[18].mxu1  ;;  %v715_v11 = vmax.f32 %v274_v2, 0.0  ;;  %v717_v15 = vmax.f32 %v387_v4, 0.0 }
 0x103   :  { %v722_v7 = vmax.f32 %v276_v5, 0.0  ;;  %v278_v9 = vpop.f32.mrb[19].mxu0  ;;  %v724_v12 = vmax.f32 %v389_v8, 0.0  ;;  %v391_v14 = vpop.f32.mrb[19].mxu1 }
 0x104   :  { %v723_v13 = vmax.f32 %v278_v9, 0.0  ;;  %v725_v17 = vmax.f32 %v391_v14, 0.0 }
 0x105   :  { %v810_v16 = vpack.c.bf16 %v722_v7, %v714_v6  ;;  %v812_v18 = vpack.c.bf16 %v724_v12, %v716_v10 }
 0x106   :  { %v811_v19 = vpack.c.bf16 %v723_v13, %v715_v11  ;;  %v813_v20 = vpack.c.bf16 %v725_v17, %v717_v15 }
 0x108   :  { %v282_v21 = vpop.f32.mrb[20].mxu0  ;;  %857 = vmatprep.subr.bf16.mxu0 %v811_v19  ;;  %v395_v22 = vpop.f32.mrb[20].mxu1  ;;  %898 = vmatprep.subr.bf16.mxu1 %v813_v20 }
 0x109   :  { %v284_v23 = vpop.f32.mrb[21].mxu0  ;;  %858 = vmatpush1.bf16.msra.mxu0 %v810_v16  ;;  %v397_v24 = vpop.f32.mrb[21].mxu1  ;;  %899 = vmatpush1.bf16.msra.mxu1 %v812_v18  ;;  %v730_v26 = vmax.f32 %v282_v21, 0.0  ;;  %v732_v30 = vmax.f32 %v395_v22, 0.0  ;;  %v1433_v21 = vld [vmem:[%s1478_s2] sm:$0xf] }
 0x10a   :  { %v286_v25 = vpop.f32.mrb[22].mxu0  ;;  %v399_v28 = vpop.f32.mrb[22].mxu1  ;;  %v731_v31 = vmax.f32 %v284_v23, 0.0  ;;  %v733_v35 = vmax.f32 %v397_v24, 0.0 }
 0x10b   :  { %v738_v27 = vmax.f32 %v286_v25, 0.0  ;;  %v288_v29 = vpop.f32.mrb[23].mxu0  ;;  %v740_v32 = vmax.f32 %v399_v28, 0.0  ;;  %v401_v34 = vpop.f32.mrb[23].mxu1 }
 0x10c   :  { %v739_v33 = vmax.f32 %v288_v29, 0.0  ;;  %v741_v37 = vmax.f32 %v401_v34, 0.0 }
 0x10d   :  { %v818_v36 = vpack.c.bf16 %v738_v27, %v730_v26  ;;  %v820_v38 = vpack.c.bf16 %v740_v32, %v732_v30 }
 0x10e   :  { %v819_v39 = vpack.c.bf16 %v739_v33, %v731_v31  ;;  %v821_v40 = vpack.c.bf16 %v741_v37, %v733_v35 }
 0x110   :  { %v292_v41 = vpop.f32.mrb[24].mxu0  ;;  %859 = vmatprep.subr.bf16.mxu0 %v819_v39  ;;  %v405_v42 = vpop.f32.mrb[24].mxu1  ;;  %900 = vmatprep.subr.bf16.mxu1 %v821_v40 }
 0x111   :  { %v294_v43 = vpop.f32.mrb[25].mxu0  ;;  %860 = vmatpush1.bf16.msra.mxu0 %v818_v36  ;;  %v407_v44 = vpop.f32.mrb[25].mxu1  ;;  %901 = vmatpush1.bf16.msra.mxu1 %v820_v38  ;;  %v746_v46 = vmax.f32 %v292_v41, 0.0  ;;  %v748_v50 = vmax.f32 %v405_v42, 0.0 }
 0x112   :  { %v296_v45 = vpop.f32.mrb[26].mxu0  ;;  %v409_v48 = vpop.f32.mrb[26].mxu1  ;;  %v747_v51 = vmax.f32 %v294_v43, 0.0  ;;  %v749_v55 = vmax.f32 %v407_v44, 0.0 }
 0x113   :  { %v754_v47 = vmax.f32 %v296_v45, 0.0  ;;  %v298_v49 = vpop.f32.mrb[27].mxu0  ;;  %v756_v52 = vmax.f32 %v409_v48, 0.0  ;;  %v411_v54 = vpop.f32.mrb[27].mxu1 }
 0x114   :  { %v755_v53 = vmax.f32 %v298_v49, 0.0  ;;  %v757_v57 = vmax.f32 %v411_v54, 0.0 }
 0x115   :  { %v826_v56 = vpack.c.bf16 %v754_v47, %v746_v46  ;;  %v828_v58 = vpack.c.bf16 %v756_v52, %v748_v50 }
 0x116   :  { %v827_v59 = vpack.c.bf16 %v755_v53, %v747_v51  ;;  %v829_v60 = vpack.c.bf16 %v757_v57, %v749_v55 }
 0x118   :  { %v302_v61 = vpop.f32.mrb[28].mxu0  ;;  %861 = vmatprep.subr.bf16.mxu0 %v827_v59  ;;  %v415_v62 = vpop.f32.mrb[28].mxu1  ;;  %902 = vmatprep.subr.bf16.mxu1 %v829_v60 }
 0x119   :  { %v304_v63 = vpop.f32.mrb[29].mxu0  ;;  %862 = vmatpush1.bf16.msra.mxu0 %v826_v56  ;;  %v417_v0 = vpop.f32.mrb[29].mxu1  ;;  %903 = vmatpush1.bf16.msra.mxu1 %v828_v58  ;;  %v762_v2 = vmax.f32 %v302_v61, 0.0  ;;  %v764_v7 = vmax.f32 %v415_v62, 0.0 }
 0x11a   :  { %v306_v1 = vpop.f32.mrb[30].mxu0  ;;  %v419_v5 = vpop.f32.mrb[30].mxu1  ;;  %v763_v8 = vmax.f32 %v304_v63, 0.0  ;;  %v765_v12 = vmax.f32 %v417_v0, 0.0 }
 0x11b   :  { %v770_v4 = vmax.f32 %v306_v1, 0.0  ;;  %v308_v6 = vpop.f32.mrb[31].mxu0  ;;  %v772_v9 = vmax.f32 %v419_v5, 0.0  ;;  %v421_v11 = vpop.f32.mrb[31].mxu1 }
 0x11c   :  { %v771_v10 = vmax.f32 %v308_v6, 0.0  ;;  %v773_v14 = vmax.f32 %v421_v11, 0.0 }
 0x11d   :  { %v834_v13 = vpack.c.bf16 %v770_v4, %v762_v2  ;;  %v836_v15 = vpack.c.bf16 %v772_v9, %v764_v7 }
 0x11e   :  { %v835_v16 = vpack.c.bf16 %v771_v10, %v763_v8  ;;  %v837_v17 = vpack.c.bf16 %v773_v14, %v765_v12 }
 0x120   :  { %v458_v18 = vpop.f32.mrb[32].mxu0  ;;  %863 = vmatprep.subr.bf16.mxu0 %v835_v16  ;;  %v571_v19 = vpop.f32.mrb[32].mxu1  ;;  %904 = vmatprep.subr.bf16.mxu1 %v837_v17 }
 0x121   :  { %v460_v20 = vpop.f32.mrb[33].mxu0  ;;  %864 = vmatpush1.bf16.msra.mxu0 %v834_v13  ;;  %v573_v22 = vpop.f32.mrb[33].mxu1  ;;  %905 = vmatpush1.bf16.msra.mxu1 %v836_v15  ;;  %v654_v24 = vmax.f32 %v458_v18, 0.0  ;;  %v656_v28 = vmax.f32 %v571_v19, 0.0 }
 0x122   :  { %v462_v23 = vpop.f32.mrb[34].mxu0  ;;  %v575_v26 = vpop.f32.mrb[34].mxu1  ;;  %v655_v29 = vmax.f32 %v460_v20, 0.0  ;;  %v657_v33 = vmax.f32 %v573_v22, 0.0 }
 0x123   :  { %v662_v25 = vmax.f32 %v462_v23, 0.0  ;;  %v464_v27 = vpop.f32.mrb[35].mxu0  ;;  %v664_v30 = vmax.f32 %v575_v26, 0.0  ;;  %v577_v32 = vpop.f32.mrb[35].mxu1 }
 0x124   :  { %v663_v31 = vmax.f32 %v464_v27, 0.0  ;;  %882 = vmatmul.mubr.bf16.vlgmr.msra.gmra.mrb[64].mxu0 %v1433_v21  ;;  %v665_v35 = vmax.f32 %v577_v32, 0.0  ;;  %923 = vmatmul.mubr.bf16.vlgmr.msra.gmra.mrb[64].mxu1 %v1433_v21 }
 0x125   :  { %v782_v34 = vpack.c.bf16 %v662_v25, %v654_v24  ;;  %963 = vmatprep.mubr.bf16.mxu0 %v1267_v3  ;;  %v784_v36 = vpack.c.bf16 %v664_v30, %v656_v28  ;;  %1004 = vmatprep.mubr.bf16.mxu1 %v1267_v3 }
 0x126   :  { %v783_v37 = vpack.c.bf16 %v663_v31, %v655_v29  ;;  %v785_v38 = vpack.c.bf16 %v665_v35, %v657_v33 }
 0x128   :  { %v468_v39 = vpop.f32.mrb[36].mxu0  ;;  %931 = vmatprep.subr.bf16.mxu0 %v783_v37  ;;  %v581_v40 = vpop.f32.mrb[36].mxu1  ;;  %972 = vmatprep.subr.bf16.mxu1 %v785_v38 }
 0x129   :  { %v470_v41 = vpop.f32.mrb[37].mxu0  ;;  %932 = vmatpush1.bf16.msra.mxu0 %v782_v34  ;;  %v583_v42 = vpop.f32.mrb[37].mxu1  ;;  %973 = vmatpush1.bf16.msra.mxu1 %v784_v36  ;;  %v670_v44 = vmax.f32 %v468_v39, 0.0  ;;  %v672_v48 = vmax.f32 %v581_v40, 0.0 }
 0x12a   :  { %v472_v43 = vpop.f32.mrb[38].mxu0  ;;  %v585_v46 = vpop.f32.mrb[38].mxu1  ;;  %v671_v49 = vmax.f32 %v470_v41, 0.0  ;;  %v673_v3 = vmax.f32 %v583_v42, 0.0 }
 0x12b   :  { %v678_v45 = vmax.f32 %v472_v43, 0.0  ;;  %v474_v47 = vpop.f32.mrb[39].mxu0  ;;  %v680_v50 = vmax.f32 %v585_v46, 0.0  ;;  %v587_v52 = vpop.f32.mrb[39].mxu1 }
 0x12c   :  { %v679_v51 = vmax.f32 %v474_v47, 0.0  ;;  %v681_v54 = vmax.f32 %v587_v52, 0.0 }
 0x12d   :  { %v790_v53 = vpack.c.bf16 %v678_v45, %v670_v44  ;;  %v792_v55 = vpack.c.bf16 %v680_v50, %v672_v48 }
 0x12e   :  { %v791_v56 = vpack.c.bf16 %v679_v51, %v671_v49  ;;  %v793_v57 = vpack.c.bf16 %v681_v54, %v673_v3 }
 0x130   :  { %v478_v58 = vpop.f32.mrb[40].mxu0  ;;  %933 = vmatprep.subr.bf16.mxu0 %v791_v56  ;;  %v591_v59 = vpop.f32.mrb[40].mxu1  ;;  %974 = vmatprep.subr.bf16.mxu1 %v793_v57 }
 0x131   :  { %v480_v60 = vpop.f32.mrb[41].mxu0  ;;  %934 = vmatpush1.bf16.msra.mxu0 %v790_v53  ;;  %v593_v61 = vpop.f32.mrb[41].mxu1  ;;  %975 = vmatpush1.bf16.msra.mxu1 %v792_v55  ;;  %v686_v63 = vmax.f32 %v478_v58, 0.0  ;;  %v688_v4 = vmax.f32 %v591_v59, 0.0 }
 0x132   :  { %v482_v62 = vpop.f32.mrb[42].mxu0  ;;  %v595_v1 = vpop.f32.mrb[42].mxu1  ;;  %v687_v5 = vmax.f32 %v480_v60, 0.0  ;;  %v689_v9 = vmax.f32 %v593_v61, 0.0 }
 0x133   :  { %v694_v0 = vmax.f32 %v482_v62, 0.0  ;;  %v484_v2 = vpop.f32.mrb[43].mxu0  ;;  %v696_v6 = vmax.f32 %v595_v1, 0.0  ;;  %v597_v8 = vpop.f32.mrb[43].mxu1 }
 0x134   :  { %v695_v7 = vmax.f32 %v484_v2, 0.0  ;;  %v697_v11 = vmax.f32 %v597_v8, 0.0 }
 0x135   :  { %v798_v10 = vpack.c.bf16 %v694_v0, %v686_v63  ;;  %v800_v12 = vpack.c.bf16 %v696_v6, %v688_v4 }
 0x136   :  { %v799_v13 = vpack.c.bf16 %v695_v7, %v687_v5  ;;  %v801_v14 = vpack.c.bf16 %v697_v11, %v689_v9 }
 0x138   :  { %v488_v15 = vpop.f32.mrb[44].mxu0  ;;  %935 = vmatprep.subr.bf16.mxu0 %v799_v13  ;;  %v601_v16 = vpop.f32.mrb[44].mxu1  ;;  %976 = vmatprep.subr.bf16.mxu1 %v801_v14 }
 0x139   :  { %v490_v17 = vpop.f32.mrb[45].mxu0  ;;  %936 = vmatpush1.bf16.msra.mxu0 %v798_v10  ;;  %v603_v18 = vpop.f32.mrb[45].mxu1  ;;  %977 = vmatpush1.bf16.msra.mxu1 %v800_v12  ;;  %v702_v20 = vmax.f32 %v488_v15, 0.0  ;;  %v704_v25 = vmax.f32 %v601_v16, 0.0 }
 0x13a   :  { %v492_v19 = vpop.f32.mrb[46].mxu0  ;;  %v605_v23 = vpop.f32.mrb[46].mxu1  ;;  %v703_v26 = vmax.f32 %v490_v17, 0.0  ;;  %v705_v30 = vmax.f32 %v603_v18, 0.0 }
 0x13b   :  { %v710_v22 = vmax.f32 %v492_v19, 0.0  ;;  %v494_v24 = vpop.f32.mrb[47].mxu0  ;;  %v712_v27 = vmax.f32 %v605_v23, 0.0  ;;  %v607_v29 = vpop.f32.mrb[47].mxu1 }
 0x13c   :  { %v711_v28 = vmax.f32 %v494_v24, 0.0  ;;  %v713_v32 = vmax.f32 %v607_v29, 0.0 }
 0x13d   :  { %v806_v31 = vpack.c.bf16 %v710_v22, %v702_v20  ;;  %v808_v33 = vpack.c.bf16 %v712_v27, %v704_v25 }
 0x13e   :  { %v807_v34 = vpack.c.bf16 %v711_v28, %v703_v26  ;;  %v809_v35 = vpack.c.bf16 %v713_v32, %v705_v30 }
 0x140   :  { %v498_v36 = vpop.f32.mrb[48].mxu0  ;;  %937 = vmatprep.subr.bf16.mxu0 %v807_v34  ;;  %v611_v37 = vpop.f32.mrb[48].mxu1  ;;  %978 = vmatprep.subr.bf16.mxu1 %v809_v35 }
 0x141   :  { %v500_v38 = vpop.f32.mrb[49].mxu0  ;;  %938 = vmatpush1.bf16.msra.mxu0 %v806_v31  ;;  %v613_v39 = vpop.f32.mrb[49].mxu1  ;;  %979 = vmatpush1.bf16.msra.mxu1 %v808_v33  ;;  %v718_v41 = vmax.f32 %v498_v36, 0.0  ;;  %v720_v45 = vmax.f32 %v611_v37, 0.0 }
 0x142   :  { %v502_v40 = vpop.f32.mrb[50].mxu0  ;;  %v615_v43 = vpop.f32.mrb[50].mxu1  ;;  %v719_v46 = vmax.f32 %v500_v38, 0.0  ;;  %v721_v50 = vmax.f32 %v613_v39, 0.0 }
 0x143   :  { %v726_v42 = vmax.f32 %v502_v40, 0.0  ;;  %v504_v44 = vpop.f32.mrb[51].mxu0  ;;  %v728_v47 = vmax.f32 %v615_v43, 0.0  ;;  %v617_v49 = vpop.f32.mrb[51].mxu1 }
 0x144   :  { %v727_v48 = vmax.f32 %v504_v44, 0.0  ;;  %v729_v52 = vmax.f32 %v617_v49, 0.0 }
 0x145   :  { %v814_v51 = vpack.c.bf16 %v726_v42, %v718_v41  ;;  %v816_v3 = vpack.c.bf16 %v728_v47, %v720_v45 }
 0x146   :  { %v815_v53 = vpack.c.bf16 %v727_v48, %v719_v46  ;;  %v817_v54 = vpack.c.bf16 %v729_v52, %v721_v50 }
 0x148   :  { %v508_v55 = vpop.f32.mrb[52].mxu0  ;;  %939 = vmatprep.subr.bf16.mxu0 %v815_v53  ;;  %v621_v56 = vpop.f32.mrb[52].mxu1  ;;  %980 = vmatprep.subr.bf16.mxu1 %v817_v54 }
 0x149   :  { %v510_v57 = vpop.f32.mrb[53].mxu0  ;;  %940 = vmatpush1.bf16.msra.mxu0 %v814_v51  ;;  %v623_v58 = vpop.f32.mrb[53].mxu1  ;;  %981 = vmatpush1.bf16.msra.mxu1 %v816_v3  ;;  %v734_v60 = vmax.f32 %v508_v55, 0.0  ;;  %v736_v0 = vmax.f32 %v621_v56, 0.0 }
 0x14a   :  { %v512_v59 = vpop.f32.mrb[54].mxu0  ;;  %v625_v62 = vpop.f32.mrb[54].mxu1  ;;  %v735_v1 = vmax.f32 %v510_v57, 0.0  ;;  %v737_v6 = vmax.f32 %v623_v58, 0.0 }
 0x14b   :  { %v742_v61 = vmax.f32 %v512_v59, 0.0  ;;  %v514_v63 = vpop.f32.mrb[55].mxu0  ;;  %v744_v2 = vmax.f32 %v625_v62, 0.0  ;;  %v627_v5 = vpop.f32.mrb[55].mxu1 }
 0x14c   :  { %v743_v4 = vmax.f32 %v514_v63, 0.0  ;;  %v745_v8 = vmax.f32 %v627_v5, 0.0  ;;  %v1441_v3 = vpop.permute.xlu0 %846 }
 0x14d   :  { %v822_v7 = vpack.c.bf16 %v742_v61, %v734_v60  ;;  %v824_v9 = vpack.c.bf16 %v744_v2, %v736_v0 }
 0x14e   :  { %v823_v10 = vpack.c.bf16 %v743_v4, %v735_v1  ;;  %v825_v11 = vpack.c.bf16 %v745_v8, %v737_v6 }
 0x150   :  { %v518_v12 = vpop.f32.mrb[56].mxu0  ;;  %941 = vmatprep.subr.bf16.mxu0 %v823_v10  ;;  %v631_v13 = vpop.f32.mrb[56].mxu1  ;;  %982 = vmatprep.subr.bf16.mxu1 %v825_v11 }
 0x151   :  { %v520_v14 = vpop.f32.mrb[57].mxu0  ;;  %942 = vmatpush1.bf16.msra.mxu0 %v822_v7  ;;  %v633_v15 = vpop.f32.mrb[57].mxu1  ;;  %983 = vmatpush1.bf16.msra.mxu1 %v824_v9  ;;  %v750_v17 = vmax.f32 %v518_v12, 0.0  ;;  %v752_v22 = vmax.f32 %v631_v13, 0.0 }
 0x152   :  { %v522_v16 = vpop.f32.mrb[58].mxu0  ;;  %v635_v19 = vpop.f32.mrb[58].mxu1  ;;  %v751_v23 = vmax.f32 %v520_v14, 0.0  ;;  %v753_v27 = vmax.f32 %v633_v15, 0.0 }
 0x153   :  { %v758_v18 = vmax.f32 %v522_v16, 0.0  ;;  %v524_v20 = vpop.f32.mrb[59].mxu0  ;;  %v760_v24 = vmax.f32 %v635_v19, 0.0  ;;  %v637_v26 = vpop.f32.mrb[59].mxu1 }
 0x154   :  { %v759_v25 = vmax.f32 %v524_v20, 0.0  ;;  %v761_v29 = vmax.f32 %v637_v26, 0.0 }
 0x155   :  { %v830_v28 = vpack.c.bf16 %v758_v18, %v750_v17  ;;  %v832_v30 = vpack.c.bf16 %v760_v24, %v752_v22 }
 0x156   :  { %v831_v31 = vpack.c.bf16 %v759_v25, %v751_v23  ;;  %v833_v32 = vpack.c.bf16 %v761_v29, %v753_v27 }
 0x158   :  { %v528_v33 = vpop.f32.mrb[60].mxu0  ;;  %943 = vmatprep.subr.bf16.mxu0 %v831_v31  ;;  %v641_v34 = vpop.f32.mrb[60].mxu1  ;;  %984 = vmatprep.subr.bf16.mxu1 %v833_v32 }
 0x159   :  { %v530_v35 = vpop.f32.mrb[61].mxu0  ;;  %944 = vmatpush1.bf16.msra.mxu0 %v830_v28  ;;  %v643_v36 = vpop.f32.mrb[61].mxu1  ;;  %985 = vmatpush1.bf16.msra.mxu1 %v832_v30  ;;  %v766_v38 = vmax.f32 %v528_v33, 0.0  ;;  %v768_v42 = vmax.f32 %v641_v34, 0.0 }
 0x15a   :  { %v532_v37 = vpop.f32.mrb[62].mxu0  ;;  %v645_v40 = vpop.f32.mrb[62].mxu1  ;;  %v767_v43 = vmax.f32 %v530_v35, 0.0  ;;  %v769_v47 = vmax.f32 %v643_v36, 0.0 }
 0x15b   :  { %v774_v39 = vmax.f32 %v532_v37, 0.0  ;;  %v534_v41 = vpop.f32.mrb[63].mxu0  ;;  %v776_v44 = vmax.f32 %v645_v40, 0.0  ;;  %v647_v46 = vpop.f32.mrb[63].mxu1 }
 0x15c   :  { %v775_v45 = vmax.f32 %v534_v41, 0.0  ;;  %v777_v49 = vmax.f32 %v647_v46, 0.0 }
 0x15d   :  { %v838_v48 = vpack.c.bf16 %v774_v39, %v766_v38  ;;  %v840_v50 = vpack.c.bf16 %v776_v44, %v768_v42 }
 0x15e   :  { %v839_v51 = vpack.c.bf16 %v775_v45, %v767_v43  ;;  %v841_v52 = vpack.c.bf16 %v777_v49, %v769_v47 }
 0x160   :  { %945 = vmatprep.subr.bf16.mxu0 %v839_v51  ;;  %986 = vmatprep.subr.bf16.mxu1 %v841_v52 }
 0x161   :  { %946 = vmatpush1.bf16.msra.mxu0 %v838_v48  ;;  %987 = vmatpush1.bf16.msra.mxu1 %v840_v50 }
 0x164   :  { %964 = vmatmul.mubr.bf16.vlgmr.msra.gmra.mrb[68].mxu0 %v1433_v21  ;;  %1005 = vmatmul.mubr.bf16.vlgmr.msra.gmra.mrb[68].mxu1 %v1433_v21 }
 0x1f7   :  { %v883_v53 = vpop.f32.mrb[64].mxu0  ;;  %v924_v55 = vpop.f32.mrb[64].mxu1 }
 0x1f8   :  { %v884_v54 = vadd.f32 %v883_v53, %v1441_v3  ;;  %v885_v56 = vpop.f32.mrb[65].mxu0  ;;  %v925_v57 = vadd.f32 %v924_v55, %v1441_v3  ;;  %v926_v59 = vpop.f32.mrb[65].mxu1 }
 0x1f9   :  { %v886_v58 = vadd.f32 %v885_v56, %v1441_v3  ;;  %v887_v60 = vpop.f32.mrb[66].mxu0  ;;  %v927_v62 = vadd.f32 %v926_v59, %v1441_v3  ;;  %v928_v63 = vpop.f32.mrb[66].mxu1 }
 0x1fa   :  { %v1013_v61 = vrot.slane %v884_v54, 4  ;;  %v888_v0 = vpop.f32.mrb[67].mxu0  ;;  %v1025_v1 = vrot.slane %v925_v57, 4  ;;  %v929_v2 = vpop.f32.mrb[67].mxu1 }
 0x1fb   :  { %v1019_v21 = vrot.slane %v886_v58, 4  ;;  %v1031_v5 = vrot.slane %v927_v62, 4 }
 0x1fc   :  { %v1014_v4 = vmax.f32 %v884_v54, %v1013_v61  ;;  %v1026_v6 = vmax.f32 %v925_v57, %v1025_v1 }
 0x1fd   :  { %v1020_v7 = vmax.f32 %v886_v58, %v1019_v21  ;;  %v1032_v9 = vmax.f32 %v927_v62, %v1031_v5 }
 0x1fe   :  { %v1015_v8 = vrot.slane %v1014_v4, 2  ;;  %v1027_v10 = vrot.slane %v1026_v6, 2 }
 0x1ff   :  { %v1021_v11 = vrot.slane %v1020_v7, 2  ;;  %v1033_v13 = vrot.slane %v1032_v9, 2 }
 0x200   :  { %v1016_v12 = vmax.f32 %v1014_v4, %v1015_v8  ;;  %v1028_v14 = vmax.f32 %v1026_v6, %v1027_v10 }
 0x201   :  { %v1022_v15 = vmax.f32 %v1020_v7, %v1021_v11  ;;  %v1034_v17 = vmax.f32 %v1032_v9, %v1033_v13 }
 0x202   :  { %v1017_v16 = vrot.slane %v1016_v12, 1  ;;  %v1029_v18 = vrot.slane %v1028_v14, 1 }
 0x203   :  { %v1023_v19 = vrot.slane %v1022_v15, 1  ;;  %v1035_v22 = vrot.slane %v1034_v17, 1 }
 0x204   :  { %v1018_v20 = vmax.f32 %v1016_v12, %v1017_v16  ;;  %v1030_v23 = vmax.f32 %v1028_v14, %v1029_v18 }
 0x205   :  { %v1024_v24 = vmax.f32 %v1022_v15, %v1023_v19  ;;  %v1036_v26 = vmax.f32 %v1034_v17, %v1035_v22 }
 0x206   :  { %v1061_v25 = vsub.f32 %v884_v54, %v1018_v20  ;;  %v1063_v27 = vsub.f32 %v925_v57, %v1030_v23 }
 0x207   :  { %v1062_v28 = vsub.f32 %v886_v58, %v1024_v24  ;;  %v1064_v30 = vsub.f32 %v927_v62, %v1036_v26 }
 0x208   :  { %v1069_v29 = vmul.f32 1.442695, %v1061_v25  ;;  %v1073_v31 = vmul.f32 1.442695, %v1063_v27 }
 0x209   :  { %v1071_v32 = vmul.f32 1.442695, %v1062_v28  ;;  %v1075_v33 = vmul.f32 1.442695, %v1064_v30 }
 0x20a   :  { %1235 = vpow2.f32 %v1069_v29 }
 0x20b   :  { %1237 = vpow2.f32 %v1073_v31 }
 0x20c   :  { %1239 = vpow2.f32 %v1071_v32 }
 0x20d   :  { %1241 = vpow2.f32 %v1075_v33 }
 0x214   :  { %v1236_v34 = vpop.eup %1235 }
 0x215   :  { %v1238_v35 = vpop.eup %1237  ;;  %v1085_v36 = vrot.slane %v1236_v34, 4 }
 0x216   :  { %v1240_v37 = vpop.eup %1239  ;;  %v1097_v38 = vrot.slane %v1238_v35, 4 }
 0x217   :  { %v1242_v39 = vpop.eup %1241  ;;  %v1086_v40 = vadd.f32 %v1236_v34, %v1085_v36  ;;  %v1091_v41 = vrot.slane %v1240_v37, 4 }
 0x218   :  { %v1098_v42 = vadd.f32 %v1238_v35, %v1097_v38  ;;  %v1103_v43 = vrot.slane %v1242_v39, 4 }
 0x219   :  { %v1087_v44 = vrot.slane %v1086_v40, 2  ;;  %v1092_v45 = vadd.f32 %v1240_v37, %v1091_v41 }
 0x21a   :  { %v1099_v46 = vrot.slane %v1098_v42, 2  ;;  %v1104_v47 = vadd.f32 %v1242_v39, %v1103_v43 }
 0x21b   :  { %v1088_v48 = vadd.f32 %v1087_v44, %v1086_v40  ;;  %v1093_v49 = vrot.slane %v1092_v45, 2 }
 0x21c   :  { %v1100_v50 = vadd.f32 %v1099_v46, %v1098_v42  ;;  %v1105_v51 = vrot.slane %v1104_v47, 2 }
 0x21d   :  { %v1089_v52 = vrot.slane %v1088_v48, 1  ;;  %v1094_v53 = vadd.f32 %v1093_v49, %v1092_v45 }
 0x21e   :  { %v1101_v54 = vrot.slane %v1100_v50, 1  ;;  %v1106_v55 = vadd.f32 %v1105_v51, %v1104_v47 }
 0x21f   :  { %v1090_v56 = vadd.f32 %v1089_v52, %v1088_v48  ;;  %v1095_v57 = vrot.slane %v1094_v53, 1 }
 0x220   :  { %v1102_v58 = vadd.f32 %v1101_v54, %v1100_v50  ;;  %v1107_v59 = vrot.slane %v1106_v55, 1 }
 0x221   :  { %1243 = vrcp.f32 %v1090_v56  ;;  %v1096_v60 = vadd.f32 %v1095_v57, %v1094_v53 }
 0x222   :  { %1245 = vrcp.f32 %v1102_v58  ;;  %v1108_v61 = vadd.f32 %v1107_v59, %v1106_v55 }
 0x223   :  { %1247 = vrcp.f32 %v1096_v60 }
 0x224   :  { %1249 = vrcp.f32 %v1108_v61 }
 0x22b   :  { %v1244_v62 = vpop.eup %1243 }
 0x22c   :  { %v1246_v63 = vpop.eup %1245  ;;  %v1134_v0 = vmul.f32 %v1244_v62, %v1236_v34 }
 0x22d   :  { %v1248_v1 = vpop.eup %1247  ;;  %v1138_v21 = vmul.f32 %v1246_v63, %v1238_v35 }
 0x22e   :  { %v1250_v2 = vpop.eup %1249  ;;  %1149 = vst [vmem:[%s1479_s4] sm:$0xff] %v1134_v0  ;;  %v1136_v4 = vmul.f32 %v1248_v1, %v1240_v37 }
 0x22f   :  { %1151 = vst [vmem:[%s1479_s4 + $0x10] sm:$0xff] %v1138_v21  ;;  %v1140_v5 = vmul.f32 %v1250_v2, %v1242_v39 }
 0x230   :  { %1150 = vst [vmem:[%s1479_s4 + $0x8] sm:$0xff] %v1136_v4 }
 0x231   :  { %1152 = vst [vmem:[%s1479_s4 + $0x18] sm:$0xff] %v1140_v5 }
 0x237   :  { %v965_v6 = vpop.f32.mrb[68].mxu0  ;;  %v1006_v8 = vpop.f32.mrb[68].mxu1 }
 0x238   :  { %v966_v7 = vadd.f32 %v965_v6, %v1441_v3  ;;  %v967_v9 = vpop.f32.mrb[69].mxu0  ;;  %v1007_v10 = vadd.f32 %v1006_v8, %v1441_v3  ;;  %v1008_v12 = vpop.f32.mrb[69].mxu1 }
 0x239   :  { %v968_v11 = vadd.f32 %v967_v9, %v1441_v3  ;;  %v969_v13 = vpop.f32.mrb[70].mxu0  ;;  %v1009_v15 = vadd.f32 %v1008_v12, %v1441_v3  ;;  %v1010_v16 = vpop.f32.mrb[70].mxu1 }
 0x23a   :  { %v1037_v14 = vrot.slane %v966_v7, 4  ;;  %v970_v17 = vpop.f32.mrb[71].mxu0  ;;  %v1049_v18 = vrot.slane %v1007_v10, 4  ;;  %v1011_v20 = vpop.f32.mrb[71].mxu1 }
 0x23b   :  { %v1043_v19 = vrot.slane %v968_v11, 4  ;;  %v1055_v23 = vrot.slane %v1009_v15, 4 }
 0x23c   :  { %v1038_v22 = vmax.f32 %v966_v7, %v1037_v14  ;;  %v1050_v24 = vmax.f32 %v1007_v10, %v1049_v18 }
 0x23d   :  { %v1044_v25 = vmax.f32 %v968_v11, %v1043_v19  ;;  %v1056_v27 = vmax.f32 %v1009_v15, %v1055_v23 }
 0x23e   :  { %v1039_v26 = vrot.slane %v1038_v22, 2  ;;  %v1051_v28 = vrot.slane %v1050_v24, 2 }
 0x23f   :  { %v1045_v29 = vrot.slane %v1044_v25, 2  ;;  %v1057_v31 = vrot.slane %v1056_v27, 2 }
 0x240   :  { %v1040_v30 = vmax.f32 %v1038_v22, %v1039_v26  ;;  %v1052_v32 = vmax.f32 %v1050_v24, %v1051_v28 }
 0x241   :  { %v1046_v33 = vmax.f32 %v1044_v25, %v1045_v29  ;;  %v1058_v35 = vmax.f32 %v1056_v27, %v1057_v31 }
 0x242   :  { %v1041_v34 = vrot.slane %v1040_v30, 1  ;;  %v1053_v3 = vrot.slane %v1052_v32, 1 }
 0x243   :  { %v1047_v36 = vrot.slane %v1046_v33, 1  ;;  %v1059_v38 = vrot.slane %v1058_v35, 1 }
 0x244   :  { %v1042_v37 = vmax.f32 %v1040_v30, %v1041_v34  ;;  %v1054_v39 = vmax.f32 %v1052_v32, %v1053_v3 }
 0x245   :  { %v1048_v40 = vmax.f32 %v1046_v33, %v1047_v36  ;;  %v1060_v42 = vmax.f32 %v1058_v35, %v1059_v38 }
 0x246   :  { %v1065_v41 = vsub.f32 %v966_v7, %v1042_v37  ;;  %v1067_v43 = vsub.f32 %v1007_v10, %v1054_v39 }
 0x247   :  { %v1066_v44 = vsub.f32 %v968_v11, %v1048_v40  ;;  %v1068_v46 = vsub.f32 %v1009_v15, %v1060_v42 }
 0x248   :  { %v1077_v45 = vmul.f32 1.442695, %v1065_v41  ;;  %v1081_v47 = vmul.f32 1.442695, %v1067_v43 }
 0x249   :  { %v1079_v48 = vmul.f32 1.442695, %v1066_v44  ;;  %v1083_v49 = vmul.f32 1.442695, %v1068_v46 }
 0x24a   :  { %1251 = vpow2.f32 %v1077_v45 }
 0x24b   :  { %1253 = vpow2.f32 %v1081_v47 }
 0x24c   :  { %1255 = vpow2.f32 %v1079_v48 }
 0x24d   :  { %1257 = vpow2.f32 %v1083_v49 }
 0x254   :  { %v1252_v50 = vpop.eup %1251 }
 0x255   :  { %v1254_v51 = vpop.eup %1253  ;;  %v1109_v52 = vrot.slane %v1252_v50, 4 }
 0x256   :  { %v1256_v53 = vpop.eup %1255  ;;  %v1121_v54 = vrot.slane %v1254_v51, 4 }
 0x257   :  { %v1258_v55 = vpop.eup %1257  ;;  %v1110_v56 = vadd.f32 %v1252_v50, %v1109_v52  ;;  %v1115_v57 = vrot.slane %v1256_v53, 4 }
 0x258   :  { %v1122_v58 = vadd.f32 %v1254_v51, %v1121_v54  ;;  %v1127_v59 = vrot.slane %v1258_v55, 4 }
 0x259   :  { %v1111_v60 = vrot.slane %v1110_v56, 2  ;;  %v1116_v61 = vadd.f32 %v1256_v53, %v1115_v57 }
 0x25a   :  { %v1123_v62 = vrot.slane %v1122_v58, 2  ;;  %v1128_v63 = vadd.f32 %v1258_v55, %v1127_v59 }
 0x25b   :  { %v1112_v0 = vadd.f32 %v1111_v60, %v1110_v56  ;;  %v1117_v1 = vrot.slane %v1116_v61, 2 }
 0x25c   :  { %v1124_v21 = vadd.f32 %v1123_v62, %v1122_v58  ;;  %v1129_v2 = vrot.slane %v1128_v63, 2 }
 0x25d   :  { %v1113_v4 = vrot.slane %v1112_v0, 1  ;;  %v1118_v5 = vadd.f32 %v1117_v1, %v1116_v61 }
 0x25e   :  { %v1125_v6 = vrot.slane %v1124_v21, 1  ;;  %v1130_v7 = vadd.f32 %v1129_v2, %v1128_v63 }
 0x25f   :  { %v1114_v8 = vadd.f32 %v1113_v4, %v1112_v0  ;;  %v1119_v9 = vrot.slane %v1118_v5, 1 }
 0x260   :  { %v1126_v10 = vadd.f32 %v1125_v6, %v1124_v21  ;;  %v1131_v11 = vrot.slane %v1130_v7, 1 }
 0x261   :  { %1259 = vrcp.f32 %v1114_v8  ;;  %v1120_v12 = vadd.f32 %v1119_v9, %v1118_v5 }
 0x262   :  { %1261 = vrcp.f32 %v1126_v10  ;;  %v1132_v13 = vadd.f32 %v1131_v11, %v1130_v7 }
 0x263   :  { %1263 = vrcp.f32 %v1120_v12 }
 0x264   :  { %1265 = vrcp.f32 %v1132_v13 }
 0x26b   :  { %v1260_v14 = vpop.eup %1259 }
 0x26c   :  { %v1262_v15 = vpop.eup %1261  ;;  %v1142_v16 = vmul.f32 %v1260_v14, %v1252_v50 }
 0x26d   :  { %v1264_v17 = vpop.eup %1263  ;;  %v1146_v18 = vmul.f32 %v1262_v15, %v1254_v51 }
 0x26e   :  { %v1266_v19 = vpop.eup %1265  ;;  %1153 = vst [vmem:[%s1479_s4 + $0x20] sm:$0xff] %v1142_v16  ;;  %v1144_v20 = vmul.f32 %v1264_v17, %v1256_v53 }
 0x26f   :  { %1155 = vst [vmem:[%s1479_s4 + $0x30] sm:$0xff] %v1146_v18  ;;  %v1148_v22 = vmul.f32 %v1266_v19, %v1258_v55 }
 0x270   :  { %1154 = vst [vmem:[%s1479_s4 + $0x28] sm:$0xff] %v1144_v20 }
 0x271   :  { %1156 = vst [vmem:[%s1479_s4 + $0x38] sm:$0xff] %v1148_v22 }

</bundles_post_ra>
